<compile_context>
chip_gen: v6e
topology: v6e:2x2x1
jax: 0.10.0
libtpu: 0.0.40
codegen_flags: <defaults>
</compile_context>

<pallas_src>
import functools

import jax
import jax.numpy as jnp
from jax.experimental import pallas as pl
from jax.experimental.pallas import tpu as pltpu

_BN_EPS = 1e-5
_SCOPED_VMEM_BUDGET = 32 * 1024 * 1024  # v7x scoped default (64 MiB physical / TC)


def _gcn_fused_kernel(a_ref, x_ref, wt_ref, gamma_ref, beta_ref, o_ref):
    """Fused y = ReLU(BN_train(A @ x @ W^T)) on lane-dense (N, Fp) tiles."""
    b_sz, n, _ = a_ref.shape

    # --- Linear first, then neighborhood aggregation (both on the MXU) ------
    # Static Python unroll over B (tiny): no reshape, no batched-einsum
    # transpose/relayout; every product is lane-dense (N, Fp).
    lin = []
    for b in range(b_sz):
        xw = jnp.dot(x_ref[b], wt_ref[...],
                     preferred_element_type=jnp.float32)          # (N, Fp)
        lin.append(jnp.dot(a_ref[b], xw,
                           preferred_element_type=jnp.float32))   # (N, Fp)

    # --- training-mode BN stats in one reduction pass (sum + sum of squares) -
    s = lin[0].sum(axis=0, keepdims=True)
    ss = (lin[0] * lin[0]).sum(axis=0, keepdims=True)
    for b in range(1, b_sz):
        s = s + lin[b].sum(axis=0, keepdims=True)
        ss = ss + (lin[b] * lin[b]).sum(axis=0, keepdims=True)
    inv_cnt = 1.0 / (b_sz * n)
    mean = s * inv_cnt
    var = ss * inv_cnt - mean * mean          # biased variance (training mode)

    # --- BN folded to a single scale/shift; rsqrt goes to the EUP -----------
    scale = gamma_ref[...] * jax.lax.rsqrt(var + _BN_EPS)         # (1, Fp)
    shift = beta_ref[...] - mean * scale                          # (1, Fp)

    # --- scale/shift + ReLU, lane-dense (unmasked) stores --------------------
    for b in range(b_sz):
        o_ref[b] = jnp.maximum(lin[b] * scale + shift, 0.0)


def _round_up(v, m):
    return ((v + m - 1) // m) * m


def _pad_last(arr, target):
    pad = target - arr.shape[-1]
    if pad == 0:
        return arr
    return jnp.pad(arr, [(0, 0)] * (arr.ndim - 1) + [(0, pad)])


def _vmem_layout_bytes(shape, dtype):
    """VMEM bytes for one buffer after (sublane, 128) layout tiling.

    f32 tiles are (8, 128); sub-32-bit dtypes pack along sublanes (bf16 ->
    (16, 128)).  Leading dims multiply through unpadded.
    """
    itemsize = jnp.dtype(dtype).itemsize
    sub_tile = 8 * (4 // itemsize)
    dims = (1,) * max(0, 2 - len(shape)) + tuple(int(d) for d in shape)
    *lead, s, l = dims
    n = 1
    for d in lead:
        n *= d
    n *= _round_up(s, sub_tile) * _round_up(l, 128)
    return n * itemsize


def prepare_gcn_params(weight, bias, gamma, beta, *, mxu_dtype=jnp.float32):
    """One-time parameter prep, hoisted out of the per-call path.

    - W is transposed and zero-padded to a lane-dense (F_in, Fp) layout
      (Fp = next multiple of 128); gamma/beta are zero-padded to (1, Fp).
    - The fc bias is dropped: training-mode BatchNorm subtracts the per-feature
      mean right after the Linear, so it cancels exactly.
    - All-zero padded columns stay exactly zero through BN/ReLU
      (numerator 0, var 0, gamma = beta = 0).
    - mxu_dtype=jnp.bfloat16 enables the bf16 MXU path (recommended default on
      v6e/v7x: ~2x MXU rate, half the DMA/VMEM bytes for A, x, W; f32 accumulate).
    """
    del bias  # cancels under training-mode BatchNorm
    f_out, _ = weight.shape
    fp = _round_up(f_out, 128)
    w_t = _pad_last(weight.T.astype(jnp.float32), fp).astype(mxu_dtype)
    gamma_p = _pad_last(gamma.reshape(1, f_out).astype(jnp.float32), fp)
    beta_p = _pad_last(beta.reshape(1, f_out).astype(jnp.float32), fp)
    return w_t, gamma_p, beta_p


@functools.partial(jax.jit, static_argnames=("f_out",))
def gcn_layer(x, A, w_t, gamma_p, beta_p, *, f_out):
    """Pallas implementation of GCNLayer.forward([x, A]) -> [y, A]."""
    B, N, F_in = x.shape
    Fp = w_t.shape[-1]

    # bf16 MXU path: cast the two large activation operands to the (pre-cast)
    # weight dtype; accumulation stays f32 inside the kernel.
    if w_t.dtype != jnp.float32:
        a_in = A.astype(w_t.dtype)
        x_in = x.astype(w_t.dtype)
    else:
        a_in, x_in = A, x

    # Honest VMEM estimate: 2x double-buffering per BlockSpec'd operand plus
    # (sublane,128) layout padding, plus in-kernel f32 temporaries.
    est = (2 * _vmem_layout_bytes((B, N, N), a_in.dtype)          # A
           + 2 * _vmem_layout_bytes((B, N, F_in), x_in.dtype)     # x
           + 2 * _vmem_layout_bytes(w_t.shape, w_t.dtype)         # W^T
           + 2 * _vmem_layout_bytes(gamma_p.shape, gamma_p.dtype)
           + 2 * _vmem_layout_bytes(beta_p.shape, beta_p.dtype)
           + 2 * _vmem_layout_bytes((B, N, Fp), jnp.float32)      # output
           + (B + 1) * _vmem_layout_bytes((N, Fp), jnp.float32))  # lin/xw temps
    assert est < (3 * _SCOPED_VMEM_BUDGET) // 4, (
        f"fused single-program GCN kernel working set (~{est} B) exceeds the "
        "v7x-safe VMEM budget; use the tiled two-pass variant (see TODO)")
    vmem_limit = min(_SCOPED_VMEM_BUDGET, max(2 * est, 8 * 1024 * 1024))

    out = pl.pallas_call(
        _gcn_fused_kernel,
        out_shape=jax.ShapeDtypeStruct((B, N, Fp), jnp.float32),
        grid_spec=pltpu.PrefetchScalarGridSpec(
            num_scalar_prefetch=0,
            grid=(1,),
            in_specs=[
                pl.BlockSpec((B, N, N), lambda i: (0, 0, 0)),      # A
                pl.BlockSpec((B, N, F_in), lambda i: (0, 0, 0)),   # x
                pl.BlockSpec((F_in, Fp), lambda i: (0, 0)),        # W^T (padded)
                pl.BlockSpec((1, Fp), lambda i: (0, 0)),           # gamma
                pl.BlockSpec((1, Fp), lambda i: (0, 0)),           # beta
            ],
            out_specs=pl.BlockSpec((B, N, Fp), lambda i: (0, 0, 0)),
        ),
        compiler_params=pltpu.CompilerParams(
            dimension_semantics=("arbitrary",),
            vmem_limit_bytes=int(vmem_limit)),
    )(a_in, x_in, w_t, gamma_p, beta_p)

    y = out[..., :f_out]   # slice the lane padding off; no reshape needed
    return [y, A]


if __name__ == "__main__":
    B, N = 2, 16
    F_in, F_out = 8, 32

    key = jax.random.PRNGKey(0)
    kx, ka, kw, kb, kg, kbe = jax.random.split(key, 6)

    x = jax.random.normal(kx, (B, N, F_in), dtype=jnp.float32)

    # Random adjacency with self-loops, row-normalized (typical GCN input).
    A_raw = (jax.random.uniform(ka, (B, N, N)) > 0.7).astype(jnp.float32)
    A_raw = A_raw + jnp.eye(N, dtype=jnp.float32)[None]
    A = A_raw / jnp.sum(A_raw, axis=-1, keepdims=True)

    # nn.Linear(F_in, F_out) params; BatchNorm1d affine params.
    bound = 1.0 / (F_in ** 0.5)
    weight = jax.random.uniform(kw, (F_out, F_in), minval=-bound, maxval=bound,
                                dtype=jnp.float32)
    bias = jax.random.uniform(kb, (F_out,), minval=-bound, maxval=bound,
                              dtype=jnp.float32)
    gamma = 1.0 + 0.1 * jax.random.normal(kg, (F_out,), dtype=jnp.float32)
    beta = 0.1 * jax.random.normal(kbe, (F_out,), dtype=jnp.float32)

    # Pure-JAX reference: bmm -> Linear(+bias) -> training-mode BN -> ReLU.
    # (The bias is included here; the kernel exploits its cancellation under BN.)
    lin_ref = jnp.einsum("bnm,bmf->bnf", A, x) @ weight.T + bias
    mean = jnp.mean(lin_ref, axis=(0, 1), keepdims=True)
    var = jnp.mean((lin_ref - mean) ** 2, axis=(0, 1), keepdims=True)
    y_ref = jnp.maximum((lin_ref - mean) / jnp.sqrt(var + 1e-5) * gamma + beta,
                        0.0)

    # --- f32 MXU path: matches the f32 PyTorch module to tight tolerance ----
    w_t, gamma_p, beta_p = prepare_gcn_params(weight, bias, gamma, beta)
    y, A_out = gcn_layer(x, A, w_t, gamma_p, beta_p, f_out=F_out)
    jax.block_until_ready(y)
    jax.block_until_ready(A_out)

    assert y.shape == (B, N, F_out)
    assert jnp.allclose(y, y_ref, atol=1e-4, rtol=1e-4)
    assert jnp.allclose(A_out, A)

    # --- bf16 MXU path (recommended on v6e/v7x); numerics are looser --------
    w_t_bf, gamma_p_bf, beta_p_bf = prepare_gcn_params(
        weight, bias, gamma, beta, mxu_dtype=jnp.bfloat16)
    y_bf, _ = gcn_layer(x, A, w_t_bf, gamma_p_bf, beta_p_bf, f_out=F_out)
    jax.block_until_ready(y_bf)
    assert y_bf.shape == (B, N, F_out)
    assert jnp.allclose(y_bf, y_ref, atol=1e-1, rtol=1e-1)

    print("KERNEL_OK")
</pallas_src>

<mosaic_0001>
module attributes {stable_mosaic.version = 11 : i64} {
  func.func @_gcn_fused_kernel(%arg0: i32, %arg1: memref<2x16x16xf32, #tpu.memory_space<vmem>>, %arg2: memref<2x16x8xf32, #tpu.memory_space<vmem>>, %arg3: memref<8x128xf32, #tpu.memory_space<vmem>>, %arg4: memref<1x128xf32, #tpu.memory_space<vmem>>, %arg5: memref<1x128xf32, #tpu.memory_space<vmem>>, %arg6: memref<2x16x128xf32, #tpu.memory_space<vmem>>) attributes {dimension_semantics = [#tpu.dimension_semantics<arbitrary>], iteration_bounds = array<i64: 1>, scalar_prefetch = 0 : i64, scratch_operands = 0 : i64, tpu.core_type = #tpu.core_type<tc>, window_params = [{pipeline_mode = #tpu.pipeline_mode<synchronous>, transform_indices = @transform_0, window_bounds = array<i64: 2, 16, 16>}, {pipeline_mode = #tpu.pipeline_mode<synchronous>, transform_indices = @transform_1, window_bounds = array<i64: 2, 16, 8>}, {pipeline_mode = #tpu.pipeline_mode<synchronous>, transform_indices = @transform_2, window_bounds = array<i64: 8, 128>}, {pipeline_mode = #tpu.pipeline_mode<synchronous>, transform_indices = @transform_3, window_bounds = array<i64: 1, 128>}, {pipeline_mode = #tpu.pipeline_mode<synchronous>, transform_indices = @transform_4, window_bounds = array<i64: 1, 128>}, {pipeline_mode = #tpu.pipeline_mode<synchronous>, transform_indices = @transform_5, window_bounds = array<i64: 2, 16, 128>}]} {
    %c0 = arith.constant 0 : index
    %c0_0 = arith.constant 0 : index
    %c0_1 = arith.constant 0 : index
    %0 = vector.load %arg2[%c0, %c0_0, %c0_1] : memref<2x16x8xf32, #tpu.memory_space<vmem>>, vector<1x16x8xf32>
    %1 = vector.shape_cast %0 : vector<1x16x8xf32> to vector<16x8xf32>
    %c0_2 = arith.constant 0 : index
    %c0_3 = arith.constant 0 : index
    %2 = vector.load %arg3[%c0_2, %c0_3] : memref<8x128xf32, #tpu.memory_space<vmem>>, vector<8x128xf32>
    %cst = arith.constant dense<0.000000e+00> : vector<16x128xf32>
    %3 = tpu.matmul %1, %2, %cst {dimension_numbers = #tpu.dot_dimension_numbers<[1], [0], [0], [1], [0, 0, 1, 1], [], []>} : vector<16x8xf32>, vector<8x128xf32>, vector<16x128xf32> -> vector<16x128xf32>
    %c0_4 = arith.constant 0 : index
    %c0_5 = arith.constant 0 : index
    %c0_6 = arith.constant 0 : index
    %4 = vector.load %arg1[%c0_4, %c0_5, %c0_6] : memref<2x16x16xf32, #tpu.memory_space<vmem>>, vector<1x16x16xf32>
    %5 = vector.shape_cast %4 : vector<1x16x16xf32> to vector<16x16xf32>
    %cst_7 = arith.constant dense<0.000000e+00> : vector<16x128xf32>
    %6 = tpu.matmul %5, %3, %cst_7 {dimension_numbers = #tpu.dot_dimension_numbers<[1], [0], [0], [1], [0, 0, 1, 1], [], []>} : vector<16x16xf32>, vector<16x128xf32>, vector<16x128xf32> -> vector<16x128xf32>
    %c1 = arith.constant 1 : index
    %c0_8 = arith.constant 0 : index
    %c0_9 = arith.constant 0 : index
    %7 = vector.load %arg2[%c1, %c0_8, %c0_9] : memref<2x16x8xf32, #tpu.memory_space<vmem>>, vector<1x16x8xf32>
    %8 = vector.shape_cast %7 : vector<1x16x8xf32> to vector<16x8xf32>
    %c0_10 = arith.constant 0 : index
    %c0_11 = arith.constant 0 : index
    %9 = vector.load %arg3[%c0_10, %c0_11] : memref<8x128xf32, #tpu.memory_space<vmem>>, vector<8x128xf32>
    %cst_12 = arith.constant dense<0.000000e+00> : vector<16x128xf32>
    %10 = tpu.matmul %8, %9, %cst_12 {dimension_numbers = #tpu.dot_dimension_numbers<[1], [0], [0], [1], [0, 0, 1, 1], [], []>} : vector<16x8xf32>, vector<8x128xf32>, vector<16x128xf32> -> vector<16x128xf32>
    %c1_13 = arith.constant 1 : index
    %c0_14 = arith.constant 0 : index
    %c0_15 = arith.constant 0 : index
    %11 = vector.load %arg1[%c1_13, %c0_14, %c0_15] : memref<2x16x16xf32, #tpu.memory_space<vmem>>, vector<1x16x16xf32>
    %12 = vector.shape_cast %11 : vector<1x16x16xf32> to vector<16x16xf32>
    %cst_16 = arith.constant dense<0.000000e+00> : vector<16x128xf32>
    %13 = tpu.matmul %12, %10, %cst_16 {dimension_numbers = #tpu.dot_dimension_numbers<[1], [0], [0], [1], [0, 0, 1, 1], [], []>} : vector<16x16xf32>, vector<16x128xf32>, vector<16x128xf32> -> vector<16x128xf32>
    %cst_17 = arith.constant dense<0.000000e+00> : vector<128xf32>
    %14 = vector.multi_reduction <add>, %6, %cst_17 [0] : vector<16x128xf32> to vector<128xf32>
    %15 = vector.shape_cast %14 : vector<128xf32> to vector<1x128xf32>
    %16 = arith.mulf %6, %6 : vector<16x128xf32>
    %cst_18 = arith.constant dense<0.000000e+00> : vector<128xf32>
    %17 = vector.multi_reduction <add>, %16, %cst_18 [0] : vector<16x128xf32> to vector<128xf32>
    %18 = vector.shape_cast %17 : vector<128xf32> to vector<1x128xf32>
    %cst_19 = arith.constant dense<0.000000e+00> : vector<128xf32>
    %19 = vector.multi_reduction <add>, %13, %cst_19 [0] : vector<16x128xf32> to vector<128xf32>
    %20 = vector.shape_cast %19 : vector<128xf32> to vector<1x128xf32>
    %21 = arith.addf %15, %20 : vector<1x128xf32>
    %22 = arith.mulf %13, %13 : vector<16x128xf32>
    %cst_20 = arith.constant dense<0.000000e+00> : vector<128xf32>
    %23 = vector.multi_reduction <add>, %22, %cst_20 [0] : vector<16x128xf32> to vector<128xf32>
    %24 = vector.shape_cast %23 : vector<128xf32> to vector<1x128xf32>
    %25 = arith.addf %18, %24 : vector<1x128xf32>
    %cst_21 = arith.constant 3.125000e-02 : f32
    %26 = vector.broadcast %cst_21 : f32 to vector<1x128xf32>
    %27 = arith.mulf %21, %26 : vector<1x128xf32>
    %cst_22 = arith.constant 3.125000e-02 : f32
    %28 = vector.broadcast %cst_22 : f32 to vector<1x128xf32>
    %29 = arith.mulf %25, %28 : vector<1x128xf32>
    %30 = arith.mulf %27, %27 : vector<1x128xf32>
    %31 = arith.subf %29, %30 : vector<1x128xf32>
    %c0_23 = arith.constant 0 : index
    %c0_24 = arith.constant 0 : index
    %32 = vector.load %arg4[%c0_23, %c0_24] : memref<1x128xf32, #tpu.memory_space<vmem>>, vector<1x128xf32>
    %cst_25 = arith.constant 9.99999974E-6 : f32
    %33 = vector.broadcast %cst_25 : f32 to vector<1x128xf32>
    %34 = arith.addf %31, %33 : vector<1x128xf32>
    %35 = math.rsqrt %34 : vector<1x128xf32>
    %36 = arith.mulf %32, %35 : vector<1x128xf32>
    %c0_26 = arith.constant 0 : index
    %c0_27 = arith.constant 0 : index
    %37 = vector.load %arg5[%c0_26, %c0_27] : memref<1x128xf32, #tpu.memory_space<vmem>>, vector<1x128xf32>
    %38 = arith.mulf %27, %36 : vector<1x128xf32>
    %39 = arith.subf %37, %38 : vector<1x128xf32>
    %40 = vector.broadcast %36 : vector<1x128xf32> to vector<16x128xf32>
    %41 = arith.mulf %6, %40 : vector<16x128xf32>
    %42 = vector.broadcast %39 : vector<1x128xf32> to vector<16x128xf32>
    %43 = arith.addf %41, %42 : vector<16x128xf32>
    %cst_28 = arith.constant 0.000000e+00 : f32
    %44 = vector.broadcast %cst_28 : f32 to vector<16x128xf32>
    %45 = arith.maximumf %43, %44 : vector<16x128xf32>
    %c0_29 = arith.constant 0 : index
    %c0_30 = arith.constant 0 : index
    %c0_31 = arith.constant 0 : index
    %46 = vector.load %arg6[%c0_29, %c0_30, %c0_31] : memref<2x16x128xf32, #tpu.memory_space<vmem>>, vector<1x16x128xf32>
    %47 = vector.shape_cast %46 : vector<1x16x128xf32> to vector<16x128xf32>
    %48 = vector.shape_cast %45 : vector<16x128xf32> to vector<1x16x128xf32>
    tpu.vector_store %arg6[%c0_29, %c0_30, %c0_31], %48 {strides = array<i32>} : memref<2x16x128xf32, #tpu.memory_space<vmem>>, vector<1x16x128xf32>,
    %49 = vector.broadcast %36 : vector<1x128xf32> to vector<16x128xf32>
    %50 = arith.mulf %13, %49 : vector<16x128xf32>
    %51 = vector.broadcast %39 : vector<1x128xf32> to vector<16x128xf32>
    %52 = arith.addf %50, %51 : vector<16x128xf32>
    %cst_32 = arith.constant 0.000000e+00 : f32
    %53 = vector.broadcast %cst_32 : f32 to vector<16x128xf32>
    %54 = arith.maximumf %52, %53 : vector<16x128xf32>
    %c1_33 = arith.constant 1 : index
    %c0_34 = arith.constant 0 : index
    %c0_35 = arith.constant 0 : index
    %55 = vector.load %arg6[%c1_33, %c0_34, %c0_35] : memref<2x16x128xf32, #tpu.memory_space<vmem>>, vector<1x16x128xf32>
    %56 = vector.shape_cast %55 : vector<1x16x128xf32> to vector<16x128xf32>
    %57 = vector.shape_cast %54 : vector<16x128xf32> to vector<1x16x128xf32>
    tpu.vector_store %arg6[%c1_33, %c0_34, %c0_35], %57 {strides = array<i32>} : memref<2x16x128xf32, #tpu.memory_space<vmem>>, vector<1x16x128xf32>,
    return
  }
  func.func @transform_0(%arg0: i32) -> (i32, i32, i32) {
    %c0_i32 = arith.constant 0 : i32
    %c0_i32_0 = arith.constant 0 : i32
    %c0_i32_1 = arith.constant 0 : i32
    %c0_i32_2 = arith.constant 0 : i32
    return %c0_i32, %c0_i32_0, %c0_i32_1 : i32, i32, i32
  }
  func.func @transform_1(%arg0: i32) -> (i32, i32, i32) {
    %c0_i32 = arith.constant 0 : i32
    %c0_i32_0 = arith.constant 0 : i32
    %c0_i32_1 = arith.constant 0 : i32
    %c0_i32_2 = arith.constant 0 : i32
    return %c0_i32, %c0_i32_0, %c0_i32_1 : i32, i32, i32
  }
  func.func @transform_2(%arg0: i32) -> (i32, i32) {
    %c0_i32 = arith.constant 0 : i32
    %c0_i32_0 = arith.constant 0 : i32
    %c0_i32_1 = arith.constant 0 : i32
    return %c0_i32, %c0_i32_0 : i32, i32
  }
  func.func @transform_3(%arg0: i32) -> (i32, i32) {
    %c0_i32 = arith.constant 0 : i32
    %c0_i32_0 = arith.constant 0 : i32
    %c0_i32_1 = arith.constant 0 : i32
    return %c0_i32, %c0_i32_0 : i32, i32
  }
  func.func @transform_4(%arg0: i32) -> (i32, i32) {
    %c0_i32 = arith.constant 0 : i32
    %c0_i32_0 = arith.constant 0 : i32
    %c0_i32_1 = arith.constant 0 : i32
    return %c0_i32, %c0_i32_0 : i32, i32
  }
  func.func @transform_5(%arg0: i32) -> (i32, i32, i32) {
    %c0_i32 = arith.constant 0 : i32
    %c0_i32_0 = arith.constant 0 : i32
    %c0_i32_1 = arith.constant 0 : i32
    %c0_i32_2 = arith.constant 0 : i32
    return %c0_i32, %c0_i32_0, %c0_i32_1 : i32, i32, i32
  }
}

</mosaic_0001>

<bundles_post_ra>
// kernel: gcn_layer.1
= control target key start
LH: loop header
LB: loop body
LE: loop exit
PB: predicated region body
PF: predicated region fallthrough
CT: control target
= control target key end

     0   :  { %vm24_vm0 = vcmask 64512   ;;  %s598_s0 = inlined_call_operand.vmem [shape: f32[2,16,16], index: 0, kind: input, shape index: {}]   ;;  %s599_s1 = inlined_call_operand.vmem [shape: f32[2,16,8], index: 1, kind: input, shape index: {}]   ;;  %s600_s2 = inlined_call_operand.vmem [shape: f32[8,128], index: 2, kind: input, shape index: {}]   ;;  %s601_s3 = inlined_call_operand.vmem [shape: f32[1,128], index: 3, kind: input, shape index: {}]   ;;  %s602_s4 = inlined_call_operand.vmem [shape: f32[1,128], index: 4, kind: input, shape index: {}]   ;;  %s603_s5 = inlined_call_operand.hbm [shape: f32[2,16,128], index: 5, kind: output, shape index: {}]  }
   0x1   :  { %v23_v0 = vld [vmem:[%s600_s2] sm:$0xff]  ;;  %v22_v2 = vld [vmem:[%s599_s1 + $0x8] sm:$0xff]  ;;  %v452_v3 = vld [vmem:[%s599_s1 + $0x10] sm:$0xff] }
   0x2   :  { %v21_v1 = vld [vmem:[%s599_s1] sm:$0xff]  ;;  %474 = vmatprep.subr.mxu0 %v23_v0 }
   0x3   :  { %476 = vmatprep.mubr.msk.f32.mxu0 %vm24_vm0, %v21_v1 }
   0x4   :  { %10 = vsyncpa [#allocation3], 0  ;;  %475 = vmatpush3.msra.mxu0 %v23_v0  ;;  %v453_v4 = vld [vmem:[%s599_s1 + $0x18] sm:$0xff]  ;;  %v106_v5 = vld [vmem:[%s598_s0] sm:$0xff]  ;;  %vm108_vm1 = vcmask 130048   ;;  %v404_v56 = vlaneseq  ;;  %s525_s12 = smov [#allocation2]  }
   0x5   :  { %477 = vmatmul.mubr.msk.f32.vlgmr.msra.gmra.mxu0 %vm24_vm0, %v22_v2  ;;  %486 = vmatprep.subr.mxu0 %v23_v0  ;;  %v107_v8 = vld [vmem:[%s598_s0 + $0x8] sm:$0xff]  ;;  %v456_v9 = vld [vmem:[%s598_s0 + $0x10] sm:$0xff]  ;;  %v457_v12 = vld [vmem:[%s598_s0 + $0x18] sm:$0xff]  ;;  %s437_s13 = sshll.u32 %s525_s12, 4  ;;  %s438_s13 = int_to_ptr.vmem [resolvable:$true] %s437_s13 }
   0x6   :  { %487 = vmatpush3.msra.mxu0 %v23_v0  ;;  %488 = vmatprep.mubr.msk.f32.mxu0 %vm24_vm0, %v452_v3  ;;  %v405_v57 = vshrl.u32 %v404_v56, 7  ;;  %v396_v58 = vld [vmem:[%s601_s3] sm:$0x1]  ;;  %s503_s3 = scalar_lea.vmem %s438_s13, 512  ;;  %p508_p1 = scmp.lt.s32.totalorder %s438_s13, %s438_s13 }
   0x7   :  { %483 = vmatprep.mubr.msk.f32.mxu1 %vm108_vm1, %v106_v5  ;;  %v400_v62 = vld [vmem:[%s602_s4] sm:$0x1]  ;;  %p504_p0 = scmp.ne.s32.totalorder %s438_s13, %s503_s3  ;;  %p509_p2 = scmp.lt.s32.totalorder %s503_s3, %s503_s3 }
   0x8   :  { %v406_v59 = vsub.s32 0, %v405_v57 }
   0x9   :  { %489 = vmatmul.mubr.msk.f32.vlgmr.msra.gmra.mxu0 %vm24_vm0, %v453_v4  ;;  %p510_p3 = por %p509_p2, %p508_p1 }
   0xb   :  { %p511_p4 = pnand %p510_p3, %p504_p0 }
  0xc5   :  { %v478_v6 = vpop.f32.mrf.mxu0 }
  0xc6   :  { %479 = vmatprep.subr.mxu1 %v478_v6 }
  0xc7   :  { %v97_v7 = vpop.f32.mrf.mxu0  ;;  %480 = vmatpush3.msra.mxu1 %v478_v6 }
  0xc8   :  { %481 = vmatprep.subr.mxu1 %v97_v7 }
  0xc9   :  { %482 = vmatpush3.msra.mxu1 %v97_v7  ;;  %v490_v10 = vpop.f32.mrf.mxu0 }
  0xca   :  { %484 = vmatmul.mubr.msk.f32.vlgmr.msra.gmra.mxu1 %vm108_vm1, %v107_v8  ;;  %491 = vmatprep.subr.mxu1 %v490_v10 }
  0xcb   :  { %v265_v11 = vpop.f32.mrf.mxu0  ;;  %492 = vmatpush3.msra.mxu1 %v490_v10  ;;  %495 = vmatprep.mubr.msk.f32.mxu1 %vm108_vm1, %v456_v9 }
  0xcc   :  { %493 = vmatprep.subr.mxu1 %v265_v11 }
  0xcd   :  { %494 = vmatpush3.msra.mxu1 %v265_v11 }
  0xce   :  { %496 = vmatmul.mubr.msk.f32.vlgmr.msra.gmra.mxu1 %vm108_vm1, %v457_v12 }
 0x18a   :  { %v485_v13 = vpop.f32.mrf.mxu1 }
 0x18b   :  { %v366_v15 = vmul.f32 %v485_v13, %v485_v13 }
 0x18c   :  { %v181_v14 = vpop.f32.mrf.mxu1 }
 0x18d   :  { %v358_v16 = vadd.f32 %v485_v13, %v181_v14  ;;  %v365_v17 = vmul.f32 %v181_v14, %v181_v14 }
 0x18e   :  { %v497_v18 = vpop.f32.mrf.mxu1 }
 0x18f   :  { %v359_v19 = vrot.slane %v358_v16, 4  ;;  %v367_v20 = vadd.f32 %v366_v15, %v365_v17  ;;  %v383_v21 = vmul.f32 %v497_v18, %v497_v18 }
 0x190   :  { %v349_v22 = vpop.f32.mrf.mxu1 }
 0x191   :  { %v360_v23 = vadd.f32 %v359_v19, %v358_v16  ;;  %v368_v24 = vrot.slane %v367_v20, 4  ;;  %v374_v25 = vadd.f32 %v497_v18, %v349_v22  ;;  %v382_v26 = vmul.f32 %v349_v22, %v349_v22 }
 0x193   :  { %v361_v27 = vrot.slane %v360_v23, 2  ;;  %v369_v28 = vadd.f32 %v368_v24, %v367_v20  ;;  %v375_v29 = vrot.slane %v374_v25, 4  ;;  %v384_v30 = vadd.f32 %v383_v21, %v382_v26 }
 0x195   :  { %v362_v31 = vadd.f32 %v361_v27, %v360_v23  ;;  %v370_v32 = vrot.slane %v369_v28, 2  ;;  %v376_v33 = vadd.f32 %v375_v29, %v374_v25  ;;  %v385_v34 = vrot.slane %v384_v30, 4 }
 0x197   :  { %v371_v35 = vadd.f32 %v370_v32, %v369_v28  ;;  %v377_v36 = vrot.slane %v376_v33, 2  ;;  %v386_v37 = vadd.f32 %v385_v34, %v384_v30  ;;  %v363_v38 = vrot.slane %v362_v31, 1 }
 0x199   :  { %v378_v39 = vadd.f32 %v377_v36, %v376_v33  ;;  %v387_v40 = vrot.slane %v386_v37, 2  ;;  %v372_v41 = vrot.slane %v371_v35, 1  ;;  %v364_v44 = vadd.f32 %v363_v38, %v362_v31 }
 0x19b   :  { %v379_v42 = vrot.slane %v378_v39, 1  ;;  %v388_v43 = vadd.f32 %v387_v40, %v386_v37  ;;  %v373_v47 = vadd.f32 %v372_v41, %v371_v35 }
 0x19d   :  { %v380_v45 = vadd.f32 %v379_v42, %v378_v39  ;;  %v389_v46 = vrot.slane %v388_v43, 1 }
 0x19f   :  { %v381_v48 = vadd.f32 %v380_v45, %v364_v44  ;;  %v390_v49 = vadd.f32 %v389_v46, %v388_v43 }
 0x1a1   :  { %v391_v50 = vadd.f32 %v390_v49, %v373_v47  ;;  %v392_v51 = vmul.f32 0.03125, %v381_v48 }
 0x1a3   :  { %v393_v52 = vmul.f32 0.03125, %v391_v50  ;;  %v394_v53 = vmul.f32 %v392_v51, %v392_v51 }
 0x1a5   :  { %v395_v54 = vsub.f32 %v393_v52, %v394_v53 }
 0x1a7   :  { %v397_v55 = vadd.f32 1e-05, %v395_v54 }
 0x1a9   :  { %501 = vrsqrt.f32 %v397_v55 }
 0x1b6   :  { %v502_v60 = vpop.eup %501 }
 0x1b7   :  { %v399_v61 = vmul.f32 %v502_v60, %v396_v58 }
 0x1b9   :  { %v401_v63 = vmul.f32 %v399_v61, %v392_v51  ;;  %v407_v0 = vrot.slane %v399_v61, %v406_v59 }
 0x1bb   :  { %v402_v1 = vsub.f32 %v400_v62, %v401_v63  ;;  %v409_v2 = vmul.f32 %v407_v0, %v181_v14  ;;  %v410_v3 = vmul.f32 %v485_v13, %v407_v0  ;;  %v423_v5 = vmul.f32 %v407_v0, %v349_v22 }
 0x1bc   :  { %v424_v6 = vmul.f32 %v497_v18, %v407_v0 }
 0x1bd   :  { %v415_v4 = vrot.slane %v402_v1, %v406_v59 }
 0x1bf   :  { %v425_v7 = vadd.f32 %v423_v5, %v415_v4  ;;  %v417_v8 = vadd.f32 %v415_v4, %v409_v2  ;;  %v418_v9 = vadd.f32 %v415_v4, %v410_v3  ;;  %v426_v10 = vadd.f32 %v424_v6, %v415_v4 }
 0x1c1   :  { %v427_v11 = vmax.f32 %v425_v7, 0.0  ;;  %v419_v12 = vmax.f32 %v417_v8, 0.0  ;;  %v420_v15 = vmax.f32 %v418_v9, 0.0  ;;  %v428_v16 = vmax.f32 %v426_v10, 0.0 }
 0x1c3   :  { %430 = vst [vmem:[#allocation2 + $0x10] sm:$0xff] %v427_v11  ;;  %421 = vst [vmem:[#allocation2] sm:$0xff] %v419_v12 }
 0x1c4   :  { %422 = vst [vmem:[#allocation2 + $0x8] sm:$0xff] %v420_v15  ;;  %431 = vst [vmem:[#allocation2 + $0x18] sm:$0xff] %v428_v16 }
 0x1c5   :  { %514 = shalt.err (!%p511_p4)
}
 0x1c6   :  { %s526_s4 = smov 128   ;;  %s527_s14 = smov 8  }
 0x1c7   :  { %443 = dma.vmem_to_hbm [thread:$0]  %s438_s13, 512, %s603_s5, [#allocation3], %s526_s4, %s526_s4, %s527_s14  }
 0x1c8   :  { %523 = dma.done.wait [#allocation3], 512  }
 0x1c9   :  { %524 = vsyncadd [#allocation3], 4294966784 }
 0x1ca   :  { %447 = vsyncpa [#allocation3], 1 }

</bundles_post_ra>
